<compile_context>
chip_gen: v7x
topology: tpu7x:2x2x1
jax: 0.10.0
libtpu: 0.0.40
codegen_flags: <defaults>
</compile_context>

<pallas_src>
import functools

import jax
import jax.numpy as jnp
from jax.experimental import pallas as pl
from jax.experimental.pallas import tpu as pltpu


def _attention_kernel(
    x_ref,    # (b_tile*n, dim)        f32   token-major activation rows
    wq_ref,   # (1, dim, dim_head)     bf16  Q weight of head h
    wk_ref,   # (1, dim, dim_head)     bf16  K weight of head h
    wv_ref,   # (1, dim, dim_head)     bf16  V weight of head h
    wo_ref,   # (1, dim_head, dim)     bf16  head-h rows of the output projection
    b_ref,    # (1, dim)               f32   output-projection bias
    o_ref,    # (b_tile*n, dim)        f32   output rows
    acc_ref,  # (b_tile*n, dim)        f32   scratch: output-projection accumulator
    xbf_ref,  # (b_tile*n, dim)        bf16  scratch: bf16 copy of x (hoisted cast)
    *,
    b_tile, n, dim_head, scale,
):
    h = pl.program_id(1)

    # Once per batch tile (x block is revisited across the head axis): cast the
    # activations to bf16 for the MXU and zero the projection accumulator.
    @pl.when(h == 0)
    def _init():
        xbf_ref[...] = x_ref[...].astype(jnp.bfloat16)
        acc_ref[...] = jnp.zeros_like(acc_ref)

    x = xbf_ref[...]                                            # (M, dim) bf16

    # Per-head projections: bf16 operands, f32 accumulation on the MXU.
    q = jnp.dot(x, wq_ref[0], preferred_element_type=jnp.float32)   # (M, d) f32
    k = jnp.dot(x, wk_ref[0], preferred_element_type=jnp.float32)
    v = jnp.dot(x, wv_ref[0], preferred_element_type=jnp.float32)

    # Fold the softmax scale into q (cheaper than scaling the (n, n) scores);
    # scale in f32, then cast MXU operands to bf16.  Reshapes below only split /
    # merge leading dims (last dim untouched -> no lane relayout).
    q = (q * scale).reshape(b_tile, n, dim_head).astype(jnp.bfloat16)
    k = k.reshape(b_tile, n, dim_head).astype(jnp.bfloat16)
    v = v.reshape(b_tile, n, dim_head).astype(jnp.bfloat16)

    # Scores: contract the last dim of both operands (no explicit K transpose).
    s = jnp.einsum("bnd,bmd->bnm", q, k, preferred_element_type=jnp.float32)

    # Numerically-stable softmax, entirely in f32; approx reciprocal on the EUP.
    s = s - jnp.max(s, axis=-1, keepdims=True)
    p = jnp.exp(s)
    p = p * pl.reciprocal(jnp.sum(p, axis=-1, keepdims=True), approx=True)

    # Attention-weighted values.
    o_h = jnp.einsum("bnm,bmd->bnd", p.astype(jnp.bfloat16), v,
                     preferred_element_type=jnp.float32)        # (b_tile, n, d)
    o_h = o_h.reshape(b_tile * n, dim_head).astype(jnp.bfloat16)

    # This head's slice of the output projection, accumulated across heads in f32.
    acc_ref[...] += jnp.dot(o_h, wo_ref[0], preferred_element_type=jnp.float32)

    # Last head: add the bias and store the finished rows.
    @pl.when(h == pl.num_programs(1) - 1)
    def _finalize():
        o_ref[...] = (acc_ref[...] + b_ref[...]).astype(o_ref.dtype)


def _pick_batch_tile(b, n):
    """Batch elements fused per grid step.

    Legality: the (b_tile*n, dim) block's second-to-last dim must be a multiple
    of 8 or equal the full b*n; we only ever return b itself (full) or a
    multiple-of-8 divisor of b, so the block is always legal.
    """
    if b <= 8:
        return b
    aligned = [d for d in range(8, b + 1, 8) if b % d == 0]
    if not aligned:
        return b
    target = max(8, 512 // max(n, 1))   # aim for ~512 fused MXU rows per step
    for d in sorted(aligned, reverse=True):
        if d <= target:
            return d
    return aligned[0]


@functools.partial(jax.jit, static_argnames=("heads", "dim_head"))
def cross_vit_attention(x, w_qkv, w_out, b_out, *, heads, dim_head):
    """CrossViT Attention forward.  x: (b, n, dim) f32 -> (b, n, dim) f32."""
    b, n, dim = x.shape
    inner_dim = heads * dim_head
    assert w_qkv.shape == (dim, 3 * inner_dim)
    assert w_out.shape == (inner_dim, dim)
    assert b_out.shape == (dim,)
    scale = dim_head ** -0.5

    b_tile = _pick_batch_tile(b, n)
    grid_b = b // b_tile
    rows = b_tile * n

    # Token-major activation rows; reshape is free in XLA.
    x2 = x.reshape(b * n, dim)

    # Pre-split the QKV weight per head wrapper-side (layout plumbing only) and
    # cast all matmul weights to bf16 once: (dim, 3*inner) -> (3, heads, dim, d).
    w3 = w_qkv.reshape(dim, 3, heads, dim_head).transpose(1, 2, 0, 3)
    wq = w3[0].astype(jnp.bfloat16)                          # (heads, dim, d)
    wk = w3[1].astype(jnp.bfloat16)
    wv = w3[2].astype(jnp.bfloat16)
    wo = w_out.reshape(heads, dim_head, dim).astype(jnp.bfloat16)  # (heads, d, dim)
    b2 = b_out.reshape(1, dim).astype(jnp.float32)

    kernel = functools.partial(
        _attention_kernel,
        b_tile=b_tile, n=n, dim_head=dim_head, scale=scale,
    )

    out2 = pl.pallas_call(
        kernel,
        out_shape=jax.ShapeDtypeStruct((b * n, dim), x.dtype),
        grid_spec=pltpu.PrefetchScalarGridSpec(
            num_scalar_prefetch=0,
            grid=(grid_b, heads),
            in_specs=[
                pl.BlockSpec((rows, dim), lambda i, h: (i, 0)),
                pl.BlockSpec((1, dim, dim_head), lambda i, h: (h, 0, 0)),
                pl.BlockSpec((1, dim, dim_head), lambda i, h: (h, 0, 0)),
                pl.BlockSpec((1, dim, dim_head), lambda i, h: (h, 0, 0)),
                pl.BlockSpec((1, dim_head, dim), lambda i, h: (h, 0, 0)),
                pl.BlockSpec((1, dim), lambda i, h: (0, 0)),
            ],
            out_specs=pl.BlockSpec((rows, dim), lambda i, h: (i, 0)),
            scratch_shapes=[
                pltpu.VMEM((rows, dim), jnp.float32),    # projection accumulator
                pltpu.VMEM((rows, dim), jnp.bfloat16),   # hoisted bf16 activations
            ],
        ),
        compiler_params=pltpu.CompilerParams(
            # Batch tiles are independent; the head axis carries the output
            # projection accumulator, so it must stay "arbitrary".
            dimension_semantics=("parallel", "arbitrary"),
        ),
    )(x2, wq, wk, wv, wo, b2)

    return out2.reshape(b, n, dim)


def reference_attention(x, w_qkv, w_out, b_out, *, heads, dim_head):
    """Pure-JAX reference mirroring the PyTorch forward, using the same
    bf16-operand / f32-accumulation matmul policy as the kernel."""
    b, n, dim = x.shape
    inner_dim = heads * dim_head
    scale = dim_head ** -0.5

    def mm(a, w, eq):
        return jnp.einsum(eq, a.astype(jnp.bfloat16), w.astype(jnp.bfloat16),
                          preferred_element_type=jnp.float32)

    qkv = mm(x, w_qkv, "bnd,de->bne")
    q, k, v = jnp.split(qkv, 3, axis=-1)

    def to_heads(t):
        return t.reshape(b, n, heads, dim_head).transpose(0, 2, 1, 3)

    q, k, v = map(to_heads, (q, k, v))
    dots = mm(q * scale, k, "bhid,bhjd->bhij")
    attn = jax.nn.softmax(dots, axis=-1)
    out = mm(attn, v, "bhij,bhjd->bhid")
    out = out.transpose(0, 2, 1, 3).reshape(b, n, inner_dim)
    return mm(out, w_out, "bne,ed->bnd") + b_out


if __name__ == "__main__":
    # Small shapes consistent with the module: dim=32, heads=8, dim_head=64.
    batch, seq, dim = 2, 8, 32
    heads, dim_head = 8, 64
    inner_dim = heads * dim_head

    key = jax.random.PRNGKey(0)
    kx, kqkv, kout, kb = jax.random.split(key, 4)

    x = jax.random.normal(kx, (batch, seq, dim), dtype=jnp.float32)
    # Deterministic synthetic parameters (nn.Linear-style scaling).
    w_qkv = jax.random.normal(kqkv, (dim, 3 * inner_dim), dtype=jnp.float32) * (dim ** -0.5)
    w_out = jax.random.normal(kout, (inner_dim, dim), dtype=jnp.float32) * (inner_dim ** -0.5)
    b_out = jax.random.normal(kb, (dim,), dtype=jnp.float32) * 0.02
    # TODO(synk): dropout is modeled as identity (eval mode); no in-kernel RNG dropout.

    out = cross_vit_attention(x, w_qkv, w_out, b_out, heads=heads, dim_head=dim_head)
    out = jax.block_until_ready(out)

    ref = reference_attention(x, w_qkv, w_out, b_out, heads=heads, dim_head=dim_head)
    assert out.shape == (batch, seq, dim)
    max_err = float(jnp.max(jnp.abs(out - ref)))
    # Tolerance absorbs the approx-reciprocal softmax denominator and MXU vs XLA
    # accumulation-order differences (both << 1e-2 at these magnitudes).
    assert jnp.allclose(out, ref, atol=1e-2, rtol=1e-2), f"mismatch vs reference: {max_err}"

    print("KERNEL_OK")
</pallas_src>

<mosaic_0001>
module attributes {stable_mosaic.version = 11 : i64} {
  func.func @_attention_kernel(%arg0: i32, %arg1: i32, %arg2: memref<16x32xf32, #tpu.memory_space<vmem>>, %arg3: memref<1x32x64xbf16, #tpu.memory_space<vmem>>, %arg4: memref<1x32x64xbf16, #tpu.memory_space<vmem>>, %arg5: memref<1x32x64xbf16, #tpu.memory_space<vmem>>, %arg6: memref<1x64x32xbf16, #tpu.memory_space<vmem>>, %arg7: memref<1x32xf32, #tpu.memory_space<vmem>>, %arg8: memref<16x32xf32, #tpu.memory_space<vmem>>, %arg9: memref<16x32xf32, #tpu.memory_space<vmem>>, %arg10: memref<16x32xbf16, #tpu.memory_space<vmem>>) attributes {dimension_semantics = [#tpu.dimension_semantics<parallel>, #tpu.dimension_semantics<arbitrary>], iteration_bounds = array<i64: 1, 8>, scalar_prefetch = 0 : i64, scratch_operands = 2 : i64, tpu.core_type = #tpu.core_type<tc>, window_params = [{transform_indices = @transform_0, window_bounds = array<i64: 16, 32>}, {transform_indices = @transform_1, window_bounds = array<i64: 1, 32, 64>}, {transform_indices = @transform_2, window_bounds = array<i64: 1, 32, 64>}, {transform_indices = @transform_3, window_bounds = array<i64: 1, 32, 64>}, {transform_indices = @transform_4, window_bounds = array<i64: 1, 64, 32>}, {pipeline_mode = #tpu.pipeline_mode<synchronous>, transform_indices = @transform_5, window_bounds = array<i64: 1, 32>}, {transform_indices = @transform_6, window_bounds = array<i64: 16, 32>}]} {
    %c0_i32 = arith.constant 0 : i32
    %0 = arith.cmpi eq, %arg1, %c0_i32 : i32
    %1 = arith.extui %0 : i1 to i32
    %c0_i32_0 = arith.constant 0 : i32
    %2 = arith.cmpi ne, %1, %c0_i32_0 : i32
    scf.if %2 {
      %c0_27 = arith.constant 0 : index
      %c0_28 = arith.constant 0 : index
      %45 = vector.load %arg2[%c0_27, %c0_28] : memref<16x32xf32, #tpu.memory_space<vmem>>, vector<16x32xf32>
      %46 = arith.truncf %45 : vector<16x32xf32> to vector<16x32xbf16>
      %c0_29 = arith.constant 0 : index
      %c0_30 = arith.constant 0 : index
      %47 = vector.load %arg10[%c0_29, %c0_30] : memref<16x32xbf16, #tpu.memory_space<vmem>>, vector<16x32xbf16>
      tpu.vector_store %arg10[%c0_29, %c0_30], %46 {strides = array<i32>} : memref<16x32xbf16, #tpu.memory_space<vmem>>, vector<16x32xbf16>,
      %cst_31 = arith.constant 0.000000e+00 : f32
      %48 = vector.broadcast %cst_31 : f32 to vector<16x32xf32>
      %c0_32 = arith.constant 0 : index
      %c0_33 = arith.constant 0 : index
      %49 = vector.load %arg9[%c0_32, %c0_33] : memref<16x32xf32, #tpu.memory_space<vmem>>, vector<16x32xf32>
      tpu.vector_store %arg9[%c0_32, %c0_33], %48 {strides = array<i32>} : memref<16x32xf32, #tpu.memory_space<vmem>>, vector<16x32xf32>,
    } else {
    }
    %c0 = arith.constant 0 : index
    %c0_1 = arith.constant 0 : index
    %3 = vector.load %arg10[%c0, %c0_1] : memref<16x32xbf16, #tpu.memory_space<vmem>>, vector<16x32xbf16>
    %c0_2 = arith.constant 0 : index
    %c0_3 = arith.constant 0 : index
    %c0_4 = arith.constant 0 : index
    %4 = vector.load %arg3[%c0_2, %c0_3, %c0_4] : memref<1x32x64xbf16, #tpu.memory_space<vmem>>, vector<1x32x64xbf16>
    %5 = vector.shape_cast %4 : vector<1x32x64xbf16> to vector<32x64xbf16>
    %cst = arith.constant dense<0.000000e+00> : vector<16x64xf32>
    %6 = tpu.matmul %3, %5, %cst {dimension_numbers = #tpu.dot_dimension_numbers<[1], [0], [0], [1], [0, 0, 1, 1], [], []>} : vector<16x32xbf16>, vector<32x64xbf16>, vector<16x64xf32> -> vector<16x64xf32>
    %c0_5 = arith.constant 0 : index
    %c0_6 = arith.constant 0 : index
    %c0_7 = arith.constant 0 : index
    %7 = vector.load %arg4[%c0_5, %c0_6, %c0_7] : memref<1x32x64xbf16, #tpu.memory_space<vmem>>, vector<1x32x64xbf16>
    %8 = vector.shape_cast %7 : vector<1x32x64xbf16> to vector<32x64xbf16>
    %cst_8 = arith.constant dense<0.000000e+00> : vector<16x64xf32>
    %9 = tpu.matmul %3, %8, %cst_8 {dimension_numbers = #tpu.dot_dimension_numbers<[1], [0], [0], [1], [0, 0, 1, 1], [], []>} : vector<16x32xbf16>, vector<32x64xbf16>, vector<16x64xf32> -> vector<16x64xf32>
    %c0_9 = arith.constant 0 : index
    %c0_10 = arith.constant 0 : index
    %c0_11 = arith.constant 0 : index
    %10 = vector.load %arg5[%c0_9, %c0_10, %c0_11] : memref<1x32x64xbf16, #tpu.memory_space<vmem>>, vector<1x32x64xbf16>
    %11 = vector.shape_cast %10 : vector<1x32x64xbf16> to vector<32x64xbf16>
    %cst_12 = arith.constant dense<0.000000e+00> : vector<16x64xf32>
    %12 = tpu.matmul %3, %11, %cst_12 {dimension_numbers = #tpu.dot_dimension_numbers<[1], [0], [0], [1], [0, 0, 1, 1], [], []>} : vector<16x32xbf16>, vector<32x64xbf16>, vector<16x64xf32> -> vector<16x64xf32>
    %cst_13 = arith.constant 1.250000e-01 : f32
    %13 = vector.broadcast %cst_13 : f32 to vector<16x64xf32>
    %14 = arith.mulf %6, %13 : vector<16x64xf32>
    %15 = vector.shape_cast %14 : vector<16x64xf32> to vector<2x8x64xf32>
    %16 = arith.truncf %15 : vector<2x8x64xf32> to vector<2x8x64xbf16>
    %17 = vector.shape_cast %9 : vector<16x64xf32> to vector<2x8x64xf32>
    %18 = arith.truncf %17 : vector<2x8x64xf32> to vector<2x8x64xbf16>
    %19 = vector.shape_cast %12 : vector<16x64xf32> to vector<2x8x64xf32>
    %20 = arith.truncf %19 : vector<2x8x64xf32> to vector<2x8x64xbf16>
    "tpu.trace_start"() <{level = 10 : i32, message = "bnd,bmd->bnm"}> : () -> ()
    %cst_14 = arith.constant dense<0.000000e+00> : vector<2x8x8xf32>
    %21 = tpu.matmul %16, %18, %cst_14 {dimension_numbers = #tpu.dot_dimension_numbers<[2], [2], [1], [1], [0, 0, 0, 1, 1, 1], [0], [0]>} : vector<2x8x64xbf16>, vector<2x8x64xbf16>, vector<2x8x8xf32> -> vector<2x8x8xf32>
    "tpu.trace_stop"() : () -> ()
    %cst_15 = arith.constant dense<0xFF800000> : vector<2x8xf32>
    %22 = vector.multi_reduction <maximumf>, %21, %cst_15 [2] : vector<2x8x8xf32> to vector<2x8xf32>
    %23 = vector.shape_cast %22 : vector<2x8xf32> to vector<2x8x1xf32>
    %24 = vector.broadcast %23 : vector<2x8x1xf32> to vector<2x8x8xf32>
    %25 = arith.subf %21, %24 : vector<2x8x8xf32>
    %26 = math.exp %25 : vector<2x8x8xf32>
    %cst_16 = arith.constant dense<0.000000e+00> : vector<2x8xf32>
    %27 = vector.multi_reduction <add>, %26, %cst_16 [2] : vector<2x8x8xf32> to vector<2x8xf32>
    %28 = vector.shape_cast %27 : vector<2x8xf32> to vector<2x8x1xf32>
    %29 = tpu.reciprocal %28 {approx = true} : vector<2x8x1xf32> -> vector<2x8x1xf32>
    %30 = vector.broadcast %29 : vector<2x8x1xf32> to vector<2x8x8xf32>
    %31 = arith.mulf %26, %30 : vector<2x8x8xf32>
    %32 = arith.truncf %31 : vector<2x8x8xf32> to vector<2x8x8xbf16>
    "tpu.trace_start"() <{level = 10 : i32, message = "bnm,bmd->bnd"}> : () -> ()
    %cst_17 = arith.constant dense<0.000000e+00> : vector<2x8x64xf32>
    %33 = tpu.matmul %32, %20, %cst_17 {dimension_numbers = #tpu.dot_dimension_numbers<[2], [1], [1], [2], [0, 0, 0, 1, 1, 2], [0], [0]>} : vector<2x8x8xbf16>, vector<2x8x64xbf16>, vector<2x8x64xf32> -> vector<2x8x64xf32>
    "tpu.trace_stop"() : () -> ()
    %34 = vector.shape_cast %33 : vector<2x8x64xf32> to vector<16x64xf32>
    %35 = arith.truncf %34 : vector<16x64xf32> to vector<16x64xbf16>
    %c0_18 = arith.constant 0 : index
    %c0_19 = arith.constant 0 : index
    %36 = vector.load %arg9[%c0_18, %c0_19] : memref<16x32xf32, #tpu.memory_space<vmem>>, vector<16x32xf32>
    %c0_20 = arith.constant 0 : index
    %c0_21 = arith.constant 0 : index
    %c0_22 = arith.constant 0 : index
    %37 = vector.load %arg6[%c0_20, %c0_21, %c0_22] : memref<1x64x32xbf16, #tpu.memory_space<vmem>>, vector<1x64x32xbf16>
    %38 = vector.shape_cast %37 : vector<1x64x32xbf16> to vector<64x32xbf16>
    %cst_23 = arith.constant dense<0.000000e+00> : vector<16x32xf32>
    %39 = tpu.matmul %35, %38, %cst_23 {dimension_numbers = #tpu.dot_dimension_numbers<[1], [0], [0], [1], [0, 0, 1, 1], [], []>} : vector<16x64xbf16>, vector<64x32xbf16>, vector<16x32xf32> -> vector<16x32xf32>
    %40 = arith.addf %36, %39 : vector<16x32xf32>
    %c0_24 = arith.constant 0 : index
    %c0_25 = arith.constant 0 : index
    %41 = vector.load %arg9[%c0_24, %c0_25] : memref<16x32xf32, #tpu.memory_space<vmem>>, vector<16x32xf32>
    tpu.vector_store %arg9[%c0_24, %c0_25], %40 {strides = array<i32>} : memref<16x32xf32, #tpu.memory_space<vmem>>, vector<16x32xf32>,
    %c7_i32 = arith.constant 7 : i32
    %42 = arith.cmpi eq, %arg1, %c7_i32 : i32
    %43 = arith.extui %42 : i1 to i32
    %c0_i32_26 = arith.constant 0 : i32
    %44 = arith.cmpi ne, %43, %c0_i32_26 : i32
    scf.if %44 {
      %c0_27 = arith.constant 0 : index
      %c0_28 = arith.constant 0 : index
      %45 = vector.load %arg9[%c0_27, %c0_28] : memref<16x32xf32, #tpu.memory_space<vmem>>, vector<16x32xf32>
      %c0_29 = arith.constant 0 : index
      %c0_30 = arith.constant 0 : index
      %46 = vector.load %arg7[%c0_29, %c0_30] : memref<1x32xf32, #tpu.memory_space<vmem>>, vector<1x32xf32>
      %47 = vector.broadcast %46 : vector<1x32xf32> to vector<16x32xf32>
      %48 = arith.addf %45, %47 : vector<16x32xf32>
      %c0_31 = arith.constant 0 : index
      %c0_32 = arith.constant 0 : index
      %49 = vector.load %arg8[%c0_31, %c0_32] : memref<16x32xf32, #tpu.memory_space<vmem>>, vector<16x32xf32>
      tpu.vector_store %arg8[%c0_31, %c0_32], %48 {strides = array<i32>} : memref<16x32xf32, #tpu.memory_space<vmem>>, vector<16x32xf32>,
    } else {
    }
    return
  }
  func.func @transform_0(%arg0: i32, %arg1: i32) -> (i32, i32) {
    %c0_i32 = arith.constant 0 : i32
    %c0_i32_0 = arith.constant 0 : i32
    return %arg0, %c0_i32 : i32, i32
  }
  func.func @transform_1(%arg0: i32, %arg1: i32) -> (i32, i32, i32) {
    %c0_i32 = arith.constant 0 : i32
    %c0_i32_0 = arith.constant 0 : i32
    %c0_i32_1 = arith.constant 0 : i32
    return %arg1, %c0_i32, %c0_i32_0 : i32, i32, i32
  }
  func.func @transform_2(%arg0: i32, %arg1: i32) -> (i32, i32, i32) {
    %c0_i32 = arith.constant 0 : i32
    %c0_i32_0 = arith.constant 0 : i32
    %c0_i32_1 = arith.constant 0 : i32
    return %arg1, %c0_i32, %c0_i32_0 : i32, i32, i32
  }
  func.func @transform_3(%arg0: i32, %arg1: i32) -> (i32, i32, i32) {
    %c0_i32 = arith.constant 0 : i32
    %c0_i32_0 = arith.constant 0 : i32
    %c0_i32_1 = arith.constant 0 : i32
    return %arg1, %c0_i32, %c0_i32_0 : i32, i32, i32
  }
  func.func @transform_4(%arg0: i32, %arg1: i32) -> (i32, i32, i32) {
    %c0_i32 = arith.constant 0 : i32
    %c0_i32_0 = arith.constant 0 : i32
    %c0_i32_1 = arith.constant 0 : i32
    return %arg1, %c0_i32, %c0_i32_0 : i32, i32, i32
  }
  func.func @transform_5(%arg0: i32, %arg1: i32) -> (i32, i32) {
    %c0_i32 = arith.constant 0 : i32
    %c0_i32_0 = arith.constant 0 : i32
    %c0_i32_1 = arith.constant 0 : i32
    return %c0_i32, %c0_i32_0 : i32, i32
  }
  func.func @transform_6(%arg0: i32, %arg1: i32) -> (i32, i32) {
    %c0_i32 = arith.constant 0 : i32
    %c0_i32_0 = arith.constant 0 : i32
    return %arg0, %c0_i32 : i32, i32
  }
}

</mosaic_0001>

<bundles_post_ra>
// kernel: cross_vit_attention.1
= control target key start
LH: loop header
LB: loop body
LE: loop exit
PB: predicated region body
PF: predicated region fallthrough
CT: control target
= control target key end

     0   :  { %11 = vsyncpa [#allocation5], 0  ;;  %s1231_s21 = smov 0   ;;  %s1233_s22 = smov 0   ;;  %s1372_s0 = inlined_call_operand.vmem [shape: f32[16,32], index: 0, kind: input, shape index: {}]   ;;  %s1373_s1 = inlined_call_operand.vmem [shape: bf16[8,32,64], index: 1, kind: input, shape index: {}]   ;;  %s1374_s2 = inlined_call_operand.vmem [shape: bf16[8,32,64], index: 2, kind: input, shape index: {}]   ;;  %s1375_s3 = inlined_call_operand.vmem [shape: bf16[8,32,64], index: 3, kind: input, shape index: {}]   ;;  %s1376_s4 = inlined_call_operand.vmem [shape: bf16[8,64,32], index: 4, kind: input, shape index: {}]   ;;  %s1377_s5 = inlined_call_operand.vmem [shape: f32[1,32], index: 5, kind: input, shape index: {}]   ;;  %s1378_s6 = inlined_call_operand.hbm [shape: f32[16,32], index: 6, kind: output, shape index: {}]  }
   0x1   :  { %s1235_s23 = smov 0  }
   0x2 LB: > { %s958_s24 = sadd.s32 4294967295, %s1188_s23   ;;  %s26_s25 = sadd.s32 1, %s1184_s22  ;;  %s1188_s23 = sphi %s1235_s23, %s17_s23   ;;  %s1184_s22 = sphi %s1233_s22, %s1381_s22   ;;  %s1180_s21 = sphi %s1231_s21, %s1380_s21  }
   0x3   : > { %p27_p0 = scmp.ge.s32.totalorder %s26_s25, 8  ;;  %p962_p1 = scmp.ge.s32.totalorder %s1188_s23, 1 }
   0x4   : > { %p266_p2 = scmp.lt.s32.totalorder %s1188_s23, 9 }
   0x5   : > { %s1383_s25 = smov (%p27_p0, %s26_s25), 0 }
   0x6   : > { %p267_p3 = pnand %p962_p1, %p266_p2 }
   0x7   : > { %p317_p4 = scmp.lt.s32.totalorder (!%p267_p3), %s1180_s21, 7  ;;  %p971_p5 = scmp.ne.s32.totalorder (!%p267_p3), %s1180_s21, 0 }
   0x8   : > { %270 = sbr.rel (%p267_p3) target bundleno = 1253 (0x4e5), region = 44 }
   0xf   : > { %s318_s26 = scalar_select %p317_p4, %s1180_s21, 7 }
  0x10   : > { %342 = sbr.rel (%p971_p5) target bundleno = 23 (0x17), region = 48  ;;  %v343_v0 = vld [vmem:[%s1372_s0] sm:$0xff] (!%p971_p5)  ;;  %v344_v1 = vld [vmem:[%s1372_s0 + $0x8] sm:$0xff] (!%p971_p5)  ;;  %vm346_vm0 = vcmask (!%p971_p5), 261120   ;;  %v1190_v3 = vmov (!%p971_p5), 0.0  }
  0x11   : > { %s996_s27 = sshll.u32 %s318_s26, 4  ;;  %s999_s28 = sshll.u32 %s318_s26, 5  ;;  %v345_v2 = vpack.c.bf16 (!%p971_p5), %v344_v1, %v343_v0  ;;  %348 = vst.msk [vmem:[#allocation2] sm:$0xff] (!%p971_p5), %vm346_vm0, %v1190_v3  ;;  %349 = vst.msk [vmem:[#allocation2 + $0x8] sm:$0xff] (!%p971_p5), %vm346_vm0, %v1190_v3 }
  0x12   : > { %s321_s7 = scalar_lea.vmem %s1373_s1, %s996_s27  ;;  %s326_s10 = scalar_lea.vmem %s1374_s2, %s996_s27 }
  0x13   : > { %s1263_s13 = scalar_lea.vmem %s1375_s3, %s996_s27  ;;  %s1268_s16 = scalar_lea.vmem %s1376_s4, %s999_s28  ;;  %347 = vst.msk [vmem:[#allocation3] sm:$0xff] (!%p971_p5), %vm346_vm0, %v345_v2 }
  0x17 PF: > { %v1118_v4 = vld [vmem:[%s326_s10] sm:$0xff]   ;;  %v1191_v5 = vmov 0.0   ;;  %v1120_v7 = vld [vmem:[%s326_s10 + $0x8] sm:$0xff]   ;;  %vm1192_vm1 = vmmov 0   ;;  %vm367_vm2 = vcmask 261120   ;;  %vm534_vm3 = vcmask 523264  }
  0x18   : > { %1030 = vmatprep.subr.bf16.mxu1 %v1191_v5  ;;  %1022 = vmatprep.subr.bf16.mxu0 %v1191_v5  ;;  %v1119_v6 = vld [vmem:[%s321_s7] sm:$0xff]   ;;  %v1121_v8 = vld [vmem:[%s321_s7 + $0x8] sm:$0xff]   ;;  %vm655_vm4 = vcmask 1043456   ;;  %vm627_vm5 = vcmask 64512   ;;  %v1126_v2 = vld [vmem:[%s1268_s16 + $0x10] sm:$0xff]   ;;  %p990_p6 = scmp.ne.s32.totalorder %s1180_s21, 7 }
  0x19   : > { %1031 = vmatpush3.bf16.msra.mxu1 %v1118_v4  ;;  %1034 = vmatprep.mubr.msk.bf16.mxu1 %vm1192_vm1, %v1191_v5  ;;  %v1122_v10 = vld [vmem:[%s1263_s13] sm:$0xff]   ;;  %v1123_v11 = vld [vmem:[%s1263_s13 + $0x8] sm:$0xff]   ;;  %v1127_v3 = vld [vmem:[%s1268_s16 + $0x18] sm:$0xff]  }
  0x1a   : > { %1032 = vmatprep.subr.bf16.mxu1 %v1191_v5  ;;  %1023 = vmatpush3.bf16.msra.mxu0 %v1119_v6  ;;  %v350_v9 = vld [vmem:[#allocation3] sm:$0xff]  ;;  %v1124_v60 = vld [vmem:[%s1268_s16] sm:$0xff]   ;;  %v1125_v0 = vld [vmem:[%s1268_s16 + $0x8] sm:$0xff]  }
  0x1b   : > { %1024 = vmatprep.subr.bf16.mxu0 %v1191_v5  ;;  %1026 = vmatprep.mubr.msk.bf16.mxu0 %vm1192_vm1, %v1191_v5 }
  0x1d   : > { %1033 = vmatpush3.bf16.msra.mxu1 %v1120_v7 }
  0x1e   : > { %1025 = vmatpush3.bf16.msra.mxu0 %v1121_v8  ;;  %1046 = vmatprep.subr.bf16.mxu1 %v1191_v5 }
  0x1f   : > { %1038 = vmatprep.subr.bf16.mxu0 %v1191_v5 }
  0x20   : > { %1035 = vmatmul.mubr.msk.bf16.vlgmr.msra.gmra.mrb[0].mxu1 %vm367_vm2, %v350_v9 }
  0x21   : > { %1027 = vmatmul.mubr.msk.bf16.vlgmr.msra.gmra.mrb[0].mxu0 %vm367_vm2, %v350_v9  ;;  %1048 = vmatprep.mubr.msk.bf16.mxu1 %vm1192_vm1, %v1191_v5 }
  0x22   : > { %1039 = vmatpush3.bf16.msra.mxu0 %v1122_v10  ;;  %1042 = vmatprep.mubr.msk.bf16.mxu0 %vm1192_vm1, %v1191_v5 }
  0x23   : > { %1040 = vmatprep.subr.bf16.mxu0 %v1191_v5 }
  0x26   : > { %1041 = vmatpush3.bf16.msra.mxu0 %v1123_v11 }
  0x27   : > { %1052 = vmatprep.subr.bf16.mxu0 %v1191_v5 }
  0x29   : > { %1043 = vmatmul.mubr.msk.bf16.vlgmr.msra.gmra.mrb[4].mxu0 %vm367_vm2, %v350_v9 }
  0x2a   : > { %1054 = vmatprep.mubr.msk.bf16.mxu0 %vm1192_vm1, %v1191_v5 }
  0xf3   : > { %v462_v12 = vpop.f32.mrb[0].mxu1 }
  0xf4   : > { %v530_v13 = vpack.c.bf16 %v462_v12, %v462_v12  ;;  %v1036_v14 = vpop.f32.mrb[1].mxu1  ;;  %v405_v15 = vpop.f32.mrb[0].mxu0 }
  0xf5   : > { %v465_v16 = vpop.f32.mrb[2].mxu1  ;;  %v1028_v17 = vpop.f32.mrb[1].mxu0  ;;  %v526_v21 = vmul.f32 0.125, %v405_v15  ;;  %v746_v14 = vld [vmem:[#allocation2] sm:$0xff] }
  0xf6   : > { %v539_v18 = vsel %vm534_vm3, %v530_v13, 0  ;;  %v531_v19 = vpack.c.bf16 %v465_v16, %v465_v16  ;;  %v1037_v20 = vpop.f32.mrb[3].mxu1  ;;  %v408_v22 = vpop.f32.mrb[2].mxu0  ;;  %v747_v16 = vld [vmem:[#allocation2 + $0x8] sm:$0xff] }
  0xf7   : > { %1047 = vmatpush3.bf16.xpose.msra.mxu1 %v539_v18  ;;  %v1029_v23 = vpop.f32.mrb[3].mxu0  ;;  %v528_v25 = vpack.c.bf16 %v526_v21, %v526_v21  ;;  %v527_v26 = vmul.f32 0.125, %v408_v22  ;;  %v991_v22 = vld [vmem:[%s1377_s5] ss:$0 sm:$0xff] (!%p990_p6) }
  0xf8   : > { %v585_v24 = vsel %vm534_vm3, %v531_v19, 0  ;;  %1058 = vmatprep.subr.bf16.mxu1 %v1191_v5 }
  0xf9   : > { %1053 = vmatpush3.bf16.xpose.msra.mxu0 %v585_v24  ;;  %v529_v30 = vpack.c.bf16 %v527_v26, %v527_v26 }
  0xfa   : > { %1064 = vmatprep.subr.bf16.mxu0 %v1191_v5 }
  0xfc   : > { %v519_v27 = vpop.f32.mrb[4].mxu0 }
  0xfd   : > { %v532_v28 = vpack.c.bf16 %v519_v27, %v519_v27  ;;  %v1044_v29 = vpop.f32.mrb[5].mxu0 }
  0xfe   : > { %1049 = vmatmul.mubr.msk.bf16.vlgmr.msra.gmra.mrb[4].mxu1 %vm534_vm3, %v528_v25  ;;  %v522_v31 = vpop.f32.mrb[6].mxu0 }
  0xff   : > { %v657_v32 = vsel %vm655_vm4, %v532_v28, 0  ;;  %v533_v33 = vpack.c.bf16 %v522_v31, %v522_v31  ;;  %v1045_v34 = vpop.f32.mrb[7].mxu0  ;;  %1060 = vmatprep.mubr.msk.bf16.mxu1 %vm1192_vm1, %v1191_v5 }
 0x100   : > { %1055 = vmatmul.mubr.msk.bf16.vlgmr.msra.gmra.mrb[8].mxu0 %vm534_vm3, %v529_v30  ;;  %1059 = vmatpush3.bf16.msra.mxu1 %v657_v32 }
 0x101   : > { %v703_v35 = vsel %vm655_vm4, %v533_v33, 0  ;;  %1066 = vmatprep.mubr.msk.bf16.mxu0 %vm1192_vm1, %v1191_v5  ;;  %1070 = vmatprep.subr.bf16.mxu1 %v1191_v5 }
 0x102   : > { %1065 = vmatpush3.bf16.msra.mxu0 %v703_v35 }
 0x1d1   : > { %v575_v36 = vpop.f32.mrb[4].mxu1 }
 0x1d2   : > { %v1050_v37 = vpop.f32.mrb[5].mxu1  ;;  %v628_v38 = vsel %vm627_vm5, %v575_v36, -inf }
 0x1d3   : > { %629 = vmax.xlane.f32.xlu0 %v628_v38  ;;  %v578_v39 = vpop.f32.mrb[6].mxu1  ;;  %v621_v40 = vpop.f32.mrb[8].mxu0 }
 0x1d4   : > { %v1051_v41 = vpop.f32.mrb[7].mxu1  ;;  %v1056_v42 = vpop.f32.mrb[9].mxu0  ;;  %v631_v45 = vsel %vm627_vm5, %v621_v40, -inf }
 0x1d5   : > { %v624_v43 = vpop.f32.mrb[10].mxu0 }
 0x1d6   : > { %v1057_v44 = vpop.f32.mrb[11].mxu0 }
 0x1d7   : > { %632 = vmax.xlane.f32.xlu0 %v631_v45 }
 0x260   : > { %v630_v46 = vpop.xlane.xlu0 %629 }
 0x261   : > { %v634_v47 = vsub.f32 %v575_v36, %v630_v46 }
 0x263   : > { %v636_v48 = vmul.f32 1.442695, %v634_v47 }
 0x264   : > { %v633_v49 = vpop.xlane.xlu0 %632 }
 0x265   : > { %1128 = vpow2.f32 %v636_v48  ;;  %v635_v50 = vsub.f32 %v621_v40, %v633_v49 }
 0x267   : > { %v638_v51 = vmul.f32 1.442695, %v635_v50 }
 0x269   : > { %1130 = vpow2.f32 %v638_v51 }
 0x26f   : > { %v1129_v52 = vpop.eup %1128 }
 0x270   : > { %v640_v53 = vsel %vm627_vm5, %v1129_v52, 0.0 }
 0x271   : > { %641 = vadd.xlane.f32.xlu1 %v640_v53 }
 0x273   : > { %v1131_v54 = vpop.eup %1130 }
 0x274   : > { %v643_v55 = vsel %vm627_vm5, %v1131_v54, 0.0 }
 0x275   : > { %644 = vadd.xlane.f32.xlu1 %v643_v55 }
 0x2fe   : > { %v642_v56 = vpop.xlane.xlu1 %641 }
 0x2ff   : > { %1132 = vrcp.f32 %v642_v56 }
 0x302   : > { %v645_v57 = vpop.xlane.xlu1 %644 }
 0x303   : > { %1134 = vrcp.f32 %v645_v57 }
 0x309   : > { %v1133_v58 = vpop.eup %1132 }
 0x30a   : > { %v648_v59 = vmul.f32 %v1133_v58, %v1129_v52 }
 0x30c   : > { %v650_v61 = vpack.c.bf16 %v648_v59, %v648_v59 }
 0x30d   : > { %v1135_v62 = vpop.eup %1134 }
 0x30e   : > { %v649_v63 = vmul.f32 %v1135_v62, %v1131_v54  ;;  %1061 = vmatmul.mubr.msk.bf16.vlgmr.msra.gmra.mrb[8].mxu1 %vm627_vm5, %v650_v61 }
 0x30f   : > { %1071 = vmatpush3.bf16.msra.mxu1 %v1124_v60  ;;  %1078 = vmatprep.mubr.msk.bf16.mxu1 %vm1192_vm1, %v1191_v5 }
 0x310   : > { %v651_v1 = vpack.c.bf16 %v649_v63, %v649_v63  ;;  %1072 = vmatprep.subr.bf16.mxu1 %v1191_v5 }
 0x312   : > { %1067 = vmatmul.mubr.msk.bf16.vlgmr.msra.gmra.mrb[12].mxu0 %vm627_vm5, %v651_v1 }
 0x313   : > { %1073 = vmatpush3.bf16.msra.mxu1 %v1125_v0 }
 0x314   : > { %1074 = vmatprep.subr.bf16.mxu1 %v1191_v5 }
 0x317   : > { %1075 = vmatpush3.bf16.msra.mxu1 %v1126_v2 }
 0x318   : > { %1076 = vmatprep.subr.bf16.mxu1 %v1191_v5 }
 0x31b   : > { %1077 = vmatpush3.bf16.msra.mxu1 %v1127_v3 }
 0x3e1   : > { %v693_v4 = vpop.f32.mrb[8].mxu1 }
 0x3e2   : > { %v1062_v6 = vpop.f32.mrb[9].mxu1 }
 0x3e3   : > { %v696_v7 = vpop.f32.mrb[10].mxu1 }
 0x3e4   : > { %v1063_v8 = vpop.f32.mrb[11].mxu1 }
 0x3e5   : > { %v739_v9 = vpop.f32.mrb[12].mxu0 }
 0x3e6   : > { %v745_v10 = vpack.c.bf16 %v739_v9, %v693_v4  ;;  %v1068_v11 = vpop.f32.mrb[13].mxu0 }
 0x3e7   : > { %v742_v12 = vpop.f32.mrb[14].mxu0 }
 0x3e8   : > { %v1069_v13 = vpop.f32.mrb[15].mxu0  ;;  %1079 = vmatmul.mubr.msk.bf16.vlgmr.msra.gmra.mrb[12].mxu1 %vm534_vm3, %v745_v10 }
 0x4ba   : > { %831 = sbr.rel (%p990_p6) target bundleno = 1227 (0x4cb), region = 52 }
 0x4bb   : > { %v817_v15 = vpop.f32.mrb[12].mxu1 }
 0x4bc   : > { %v824_v17 = vadd.f32 %v817_v15, %v746_v14  ;;  %v1080_v18 = vpop.f32.mrb[13].mxu1 }
 0x4bd   : > { %v820_v19 = vpop.f32.mrb[14].mxu1 }
 0x4be   : > { %826 = vst.msk [vmem:[#allocation2] sm:$0xff] %vm367_vm2, %v824_v17  ;;  %v825_v5 = vadd.f32 %v820_v19, %v747_v16  ;;  %v1081_v20 = vpop.f32.mrb[15].mxu1 }
 0x4c0   : > { %827 = vst.msk [vmem:[#allocation2 + $0x8] sm:$0xff] %vm367_vm2, %v825_v5 }
 0x4c5   : > { %v832_v21 = vld [vmem:[#allocation2] sm:$0xff] }
 0x4c6   : > { %v841_v24 = vadd.f32 %v991_v22, %v832_v21 }
 0x4c7   : > { %v833_v23 = vld [vmem:[#allocation2 + $0x8] sm:$0xff] }
 0x4c8   : > { %v842_v25 = vadd.f32 %v991_v22, %v833_v23  ;;  %843 = vst.msk [vmem:[#allocation4] sm:$0xff] %vm367_vm2, %v841_v24 }
 0x4ca   : > { %844 = vst.msk [vmem:[#allocation4 + $0x8] sm:$0xff] %vm367_vm2, %v842_v25 }
 0x4cb PF: > { %p1337_p7 = scmp.eq.s32.totalorder %s958_s24, 7  ;;  %s1193_s21 = smov [#allocation4]  }
 0x4cc   : > { %s854_s29 = sshll.u32 %s1193_s21, 4  ;;  %s855_s29 = int_to_ptr.vmem [resolvable:$true] %s854_s29 }
 0x4cd   : > { %s1136_s30 = scalar_lea.vmem %s855_s29, 256  ;;  %p1143_p11 = scmp.lt.s32.totalorder %s855_s29, %s855_s29 }
 0x4ce   : > { %p1137_p8 = scmp.ne.s32.totalorder %s855_s29, %s1136_s30  ;;  %p1144_p12 = scmp.lt.s32.totalorder %s1136_s30, %s1136_s30 }
 0x4d0   : > { %p1138_p9 = pnand %p1137_p8, %p1337_p7  ;;  %p1145_p13 = por %p1144_p12, %p1143_p11 }
 0x4d2   : > { %p1139_p10 = pneg %p1138_p9 }
 0x4d4   : > { %p1146_p0 = pnand %p1145_p13, %p1139_p10 }
 0x4d6   : > { %1149 = shalt.err (!%p1146_p0)
}
 0x4d7   : > { %s1150_s24 = scalar_lea.hbm %s1378_s6, 256 }
 0x4d8   : > { %p1151_p1 = scmp.ne.s32.totalorder %s1378_s6, %s1150_s24  ;;  %p1156_p4 = scmp.lt.u32.totalorder %s1150_s24, %s1378_s6 }
 0x4da   : > { %p1152_p2 = pnand %p1151_p1, %p1337_p7 }
 0x4dc   : > { %p1153_p3 = pneg %p1152_p2 }
 0x4de   : > { %p1158_p5 = pnand %p1156_p4, %p1153_p3 }
 0x4e0   : > { %1161 = shalt.err (!%p1158_p5)
}
 0x4e1   : > { %s1194_s13 = smov 128   ;;  %s1195_s14 = smov 8  }
 0x4e2   : > { %1083 = dma.vmem_to_hbm [thread:$0]  (%p1337_p7), %s855_s29, 256, %s1378_s6, [#allocation5], %s1194_s13, %s1194_s13, %s1195_s14  }
 0x4e3   : > { %1175 = dma.done.wait (%p1337_p7), [#allocation5], 256  }
 0x4e4   : > { %1177 = vsyncadd (%p1337_p7), [#allocation5], 4294967040 }
 0x4e5 PF: > { %s17_s23 = sadd.s32 1, %s1188_s23   ;;  %s1380_s21 = smov %s1184_s22 }
 0x4e6   : > { %p14_p6 = scmp.ge.s32.totalorder %s17_s23, 10   ;;  %s1381_s22 = smov %s1383_s25 }
 0x4e8   :  { %16 = sbr.rel (!%p14_p6) target bundleno = 2 (0x2), region = 92 }
 0x4ef   :  { %870 = vsyncpa [#allocation5], 1 }
 0x4f0   :  { %872 = vsyncpa [#allocation5 + $0x1], 1 }

</bundles_post_ra>
